<compile_context>
chip_gen: v6e
topology: v6e:2x2x1
jax: 0.10.0
libtpu: 0.0.40
codegen_flags: <defaults>
</compile_context>

<pallas_src>
import functools

import jax
import jax.numpy as jnp
from jax.experimental import pallas as pl
from jax.experimental.pallas import tpu as pltpu

RANDOM_DIRECTIONS_N = 8   # input features (F)
HIDDEN = 32               # hidden units (H)
OUT = 1
GROUP = 16                # samples packed per 128-lane row: GROUP * F = 128

_DEFAULT_TB = 65536       # batch-tile in samples; multiple of 128


def _round_up(n, m):
    return -(-n // m) * m


def _binary_model_kernel(xp_ref, w1_ref, b1_ref, w2_ref, b2_ref, o_ref):
    # xp_ref: (R, 128)  packed input, lane = local_sample*8 + feature
    # w1_ref: (128, 512) block-diag replicated W1^T   b1_ref: (1, 512) tiled bias
    # w2_ref: (512, 16)  block-diag replicated W2^T   b2_ref: (1, 16)  tiled bias
    # o_ref : (R, 16)    packed output, lane = local_sample
    xp = xp_ref[...]
    h = jnp.dot(xp, w1_ref[...], preferred_element_type=jnp.float32)
    h = jnp.maximum(h + b1_ref[...], 0.0)                              # (R, 512)
    z = jnp.dot(h, w2_ref[...], preferred_element_type=jnp.float32) + b2_ref[...]
    o_ref[...] = jax.nn.sigmoid(z).astype(o_ref.dtype)                 # (R, 16)


def _pack_params(w1, b1, w2, b2):
    """Block-diagonal replicate the tiny weights so the MXU eats the packed layout."""
    eye = jnp.eye(GROUP, dtype=jnp.float32)
    w1bd = jnp.kron(eye, w1.T.astype(jnp.float32))                      # (128, 512)
    b1t = jnp.tile(b1.reshape(1, HIDDEN).astype(jnp.float32), (1, GROUP))   # (1, 512)
    w2bd = jnp.kron(eye, w2.T.astype(jnp.float32))                      # (512, 16)
    b2t = jnp.tile(b2.reshape(1, OUT).astype(jnp.float32), (1, GROUP))  # (1, 16)
    return w1bd, b1t, w2bd, b2t


@functools.partial(jax.jit, static_argnames=("tb",))
def binary_model_forward(x, w1, b1, w2, b2, *, tb=_DEFAULT_TB):
    """x: (B, 8) f32; w1: (32, 8); b1: (32,); w2: (1, 32); b2: (1,) -> (B, 1) f32."""
    B = x.shape[0]
    tb = max(128, _round_up(int(tb), 128))        # samples per tile, multiple of 128

    # Pad only to a multiple of the 16-sample pack (free when B % 16 == 0).
    b_pad = _round_up(B, GROUP)
    if b_pad != B:
        x = jnp.pad(x, ((0, b_pad - B), (0, 0)))
    rows = b_pad // GROUP
    xp = x.reshape(rows, GROUP * RANDOM_DIRECTIONS_N)   # free contiguous reshape

    # Rows per tile: multiple of 8 (sublane), capped so we get >=2 tiles when there is
    # enough work (v7x megacore), single full block otherwise.
    r_req = tb // GROUP
    if rows <= r_req:
        r_tile = rows
    else:
        r_tile = max(8, min(r_req, _round_up(-(-rows // 2), 8)))
    num_tiles = -(-rows // r_tile)

    w1bd, b1t, w2bd, b2t = _pack_params(w1, b1, w2, b2)

    # Honest (padded-batch, block-diagonal) cost for XLA's scheduler.
    flops = rows * 2 * (128 * GROUP * HIDDEN + GROUP * HIDDEN * GROUP)
    bytes_accessed = (
        b_pad * RANDOM_DIRECTIONS_N * 4 + b_pad * OUT * 4
        + w1bd.size * 4 + b1t.size * 4 + w2bd.size * 4 + b2t.size * 4
    )

    out_p = pl.pallas_call(
        _binary_model_kernel,
        out_shape=jax.ShapeDtypeStruct((rows, GROUP), jnp.float32),
        grid_spec=pltpu.PrefetchScalarGridSpec(
            num_scalar_prefetch=0,
            grid=(num_tiles,),
            in_specs=[
                pl.BlockSpec((r_tile, GROUP * RANDOM_DIRECTIONS_N), lambda i: (i, 0)),
                pl.BlockSpec((GROUP * RANDOM_DIRECTIONS_N, GROUP * HIDDEN),
                             lambda i: (0, 0)),
                pl.BlockSpec((1, GROUP * HIDDEN), lambda i: (0, 0)),
                pl.BlockSpec((GROUP * HIDDEN, GROUP), lambda i: (0, 0)),
                pl.BlockSpec((1, GROUP), lambda i: (0, 0)),
            ],
            out_specs=pl.BlockSpec((r_tile, GROUP), lambda i: (i, 0)),
        ),
        compiler_params=pltpu.CompilerParams(
            dimension_semantics=("parallel",),
            vmem_limit_bytes=48 * 1024 * 1024,
        ),
        cost_estimate=pl.CostEstimate(
            flops=flops, transcendentals=b_pad, bytes_accessed=bytes_accessed),
    )(xp, w1bd, b1t, w2bd, b2t)

    # (rows, 16) -> (b_pad, 1) is a free contiguous reshape; then slice valid batch.
    return out_p.reshape(b_pad, OUT)[:B]


def init_params(key):
    """Deterministic init mimicking PyTorch nn.Linear default (U(-1/sqrt(fan_in), +))."""
    k1, k2, k3, k4 = jax.random.split(key, 4)
    bound1 = 1.0 / jnp.sqrt(RANDOM_DIRECTIONS_N)
    bound2 = 1.0 / jnp.sqrt(HIDDEN)
    w1 = jax.random.uniform(k1, (HIDDEN, RANDOM_DIRECTIONS_N),
                            minval=-bound1, maxval=bound1, dtype=jnp.float32)
    b1 = jax.random.uniform(k2, (HIDDEN,),
                            minval=-bound1, maxval=bound1, dtype=jnp.float32)
    w2 = jax.random.uniform(k3, (OUT, HIDDEN),
                            minval=-bound2, maxval=bound2, dtype=jnp.float32)
    b2 = jax.random.uniform(k4, (OUT,),
                            minval=-bound2, maxval=bound2, dtype=jnp.float32)
    return w1, b1, w2, b2


def _reference(x, w1, b1, w2, b2):
    h = jnp.maximum(x @ w1.T + b1[None, :], 0.0)
    return jax.nn.sigmoid(h @ w2.T + b2[None, :])


if __name__ == "__main__":
    key = jax.random.PRNGKey(0)
    k_x, k_x2, k_p = jax.random.split(key, 3)
    w1, b1, w2, b2 = init_params(k_p)

    # Small-shape check (single packed row, single tile).
    B = 8
    x = jax.random.normal(k_x, (B, RANDOM_DIRECTIONS_N), dtype=jnp.float32)
    out = jax.block_until_ready(binary_model_forward(x, w1, b1, w2, b2))
    ref = _reference(x, w1, b1, w2, b2)
    assert out.shape == (B, OUT)
    assert jnp.allclose(out, ref, atol=1e-5, rtol=1e-5)

    # Multi-tile + ragged-batch check (exercises grid pipelining and the edge block).
    B2 = 1000
    x2 = jax.random.normal(k_x2, (B2, RANDOM_DIRECTIONS_N), dtype=jnp.float32)
    out2 = jax.block_until_ready(binary_model_forward(x2, w1, b1, w2, b2, tb=256))
    ref2 = _reference(x2, w1, b1, w2, b2)
    assert out2.shape == (B2, OUT)
    assert jnp.allclose(out2, ref2, atol=1e-5, rtol=1e-5)

    print("KERNEL_OK")
</pallas_src>

<mosaic_0001>
module attributes {stable_mosaic.version = 11 : i64} {
  func.func @_binary_model_kernel(%arg0: i32, %arg1: memref<1x128xf32, #tpu.memory_space<vmem>>, %arg2: memref<128x512xf32, #tpu.memory_space<vmem>>, %arg3: memref<1x512xf32, #tpu.memory_space<vmem>>, %arg4: memref<512x16xf32, #tpu.memory_space<vmem>>, %arg5: memref<1x16xf32, #tpu.memory_space<vmem>>, %arg6: memref<1x16xf32, #tpu.memory_space<vmem>>) attributes {dimension_semantics = [#tpu.dimension_semantics<parallel>], iteration_bounds = array<i64: 1>, scalar_prefetch = 0 : i64, scratch_operands = 0 : i64, tpu.core_type = #tpu.core_type<tc>, window_params = [{transform_indices = @transform_0, window_bounds = array<i64: 1, 128>}, {pipeline_mode = #tpu.pipeline_mode<synchronous>, transform_indices = @transform_1, window_bounds = array<i64: 128, 512>}, {pipeline_mode = #tpu.pipeline_mode<synchronous>, transform_indices = @transform_2, window_bounds = array<i64: 1, 512>}, {pipeline_mode = #tpu.pipeline_mode<synchronous>, transform_indices = @transform_3, window_bounds = array<i64: 512, 16>}, {pipeline_mode = #tpu.pipeline_mode<synchronous>, transform_indices = @transform_4, window_bounds = array<i64: 1, 16>}, {transform_indices = @transform_5, window_bounds = array<i64: 1, 16>}]} {
    %c0 = arith.constant 0 : index
    %c0_0 = arith.constant 0 : index
    %0 = vector.load %arg1[%c0, %c0_0] : memref<1x128xf32, #tpu.memory_space<vmem>>, vector<1x128xf32>
    %c0_1 = arith.constant 0 : index
    %c0_2 = arith.constant 0 : index
    %1 = vector.load %arg2[%c0_1, %c0_2] : memref<128x512xf32, #tpu.memory_space<vmem>>, vector<128x512xf32>
    %cst = arith.constant dense<0.000000e+00> : vector<1x512xf32>
    %2 = tpu.matmul %0, %1, %cst {dimension_numbers = #tpu.dot_dimension_numbers<[1], [0], [0], [1], [0, 0, 1, 1], [], []>} : vector<1x128xf32>, vector<128x512xf32>, vector<1x512xf32> -> vector<1x512xf32>
    %c0_3 = arith.constant 0 : index
    %c0_4 = arith.constant 0 : index
    %3 = vector.load %arg3[%c0_3, %c0_4] : memref<1x512xf32, #tpu.memory_space<vmem>>, vector<1x512xf32>
    %4 = arith.addf %2, %3 : vector<1x512xf32>
    %cst_5 = arith.constant 0.000000e+00 : f32
    %5 = vector.broadcast %cst_5 : f32 to vector<1x512xf32>
    %6 = arith.maximumf %4, %5 : vector<1x512xf32>
    %c0_6 = arith.constant 0 : index
    %c0_7 = arith.constant 0 : index
    %7 = vector.load %arg4[%c0_6, %c0_7] : memref<512x16xf32, #tpu.memory_space<vmem>>, vector<512x16xf32>
    %cst_8 = arith.constant dense<0.000000e+00> : vector<1x16xf32>
    %8 = tpu.matmul %6, %7, %cst_8 {dimension_numbers = #tpu.dot_dimension_numbers<[1], [0], [0], [1], [0, 0, 1, 1], [], []>} : vector<1x512xf32>, vector<512x16xf32>, vector<1x16xf32> -> vector<1x16xf32>
    %c0_9 = arith.constant 0 : index
    %c0_10 = arith.constant 0 : index
    %9 = vector.load %arg5[%c0_9, %c0_10] : memref<1x16xf32, #tpu.memory_space<vmem>>, vector<1x16xf32>
    %10 = arith.addf %8, %9 : vector<1x16xf32>
    %11 = arith.negf %10 : vector<1x16xf32>
    %12 = math.exp %11 : vector<1x16xf32>
    %cst_11 = arith.constant 1.000000e+00 : f32
    %13 = vector.broadcast %cst_11 : f32 to vector<1x16xf32>
    %14 = arith.addf %13, %12 : vector<1x16xf32>
    %15 = arith.divf %13, %14 : vector<1x16xf32>
    %c0_12 = arith.constant 0 : index
    %c0_13 = arith.constant 0 : index
    %16 = vector.load %arg6[%c0_12, %c0_13] : memref<1x16xf32, #tpu.memory_space<vmem>>, vector<1x16xf32>
    tpu.vector_store %arg6[%c0_12, %c0_13], %15 {strides = array<i32>} : memref<1x16xf32, #tpu.memory_space<vmem>>, vector<1x16xf32>,
    return
  }
  func.func @transform_0(%arg0: i32) -> (i32, i32) {
    %c0_i32 = arith.constant 0 : i32
    %c0_i32_0 = arith.constant 0 : i32
    return %arg0, %c0_i32 : i32, i32
  }
  func.func @transform_1(%arg0: i32) -> (i32, i32) {
    %c0_i32 = arith.constant 0 : i32
    %c0_i32_0 = arith.constant 0 : i32
    %c0_i32_1 = arith.constant 0 : i32
    return %c0_i32, %c0_i32_0 : i32, i32
  }
  func.func @transform_2(%arg0: i32) -> (i32, i32) {
    %c0_i32 = arith.constant 0 : i32
    %c0_i32_0 = arith.constant 0 : i32
    %c0_i32_1 = arith.constant 0 : i32
    return %c0_i32, %c0_i32_0 : i32, i32
  }
  func.func @transform_3(%arg0: i32) -> (i32, i32) {
    %c0_i32 = arith.constant 0 : i32
    %c0_i32_0 = arith.constant 0 : i32
    %c0_i32_1 = arith.constant 0 : i32
    return %c0_i32, %c0_i32_0 : i32, i32
  }
  func.func @transform_4(%arg0: i32) -> (i32, i32) {
    %c0_i32 = arith.constant 0 : i32
    %c0_i32_0 = arith.constant 0 : i32
    %c0_i32_1 = arith.constant 0 : i32
    return %c0_i32, %c0_i32_0 : i32, i32
  }
  func.func @transform_5(%arg0: i32) -> (i32, i32) {
    %c0_i32 = arith.constant 0 : i32
    %c0_i32_0 = arith.constant 0 : i32
    return %arg0, %c0_i32 : i32, i32
  }
}

</mosaic_0001>

<bundles_post_ra>
// kernel: binary_model_forward.1
= control target key start
LH: loop header
LB: loop body
LE: loop exit
PB: predicated region body
PF: predicated region fallthrough
CT: control target
= control target key end

     0   :  { %v546_v3 = vmov 0.0   ;;  %vm464_vm0 = vcmask 122880   ;;  %s973_s1 = inlined_call_operand.vmem [shape: f32[128,512], index: 1, kind: input, shape index: {}]   ;;  %s974_s0 = inlined_call_operand.vmem [shape: f32[1,128], index: 0, kind: input, shape index: {}]   ;;  %s975_s3 = inlined_call_operand.vmem [shape: f32[512,16], index: 3, kind: input, shape index: {}]   ;;  %s976_s2 = inlined_call_operand.vmem [shape: f32[1,512], index: 2, kind: input, shape index: {}]   ;;  %s977_s4 = inlined_call_operand.vmem [shape: f32[1,16], index: 4, kind: input, shape index: {}]   ;;  %s978_s5 = inlined_call_operand.vmem [shape: f32[1,16], index: 5, kind: output, shape index: {}]  }
   0x1   :  { %v82_v0 = vld [vmem:[%s973_s1 + $0x1e8] sm:$0xff]  ;;  %v84_v1 = vld [vmem:[%s973_s1 + $0x1f8] sm:$0xff]  ;;  %v81_v2 = vld [vmem:[%s973_s1 + $0x1e0] sm:$0xff]  ;;  %171 = vmatprep.mubr.f32.mxu0 %v546_v3  ;;  %242 = vmatprep.mubr.f32.mxu1 %v546_v3 }
   0x2   :  { %107 = vmatprep.subr.mxu0 %v82_v0  ;;  %178 = vmatprep.subr.mxu1 %v84_v1  ;;  %v83_v4 = vld [vmem:[%s973_s1 + $0x1f0] sm:$0xff]  ;;  %v78_v5 = vld [vmem:[%s973_s1 + $0x1c8] sm:$0xff]  ;;  %v80_v6 = vld [vmem:[%s973_s1 + $0x1d8] sm:$0xff] }
   0x3   :  { %108 = vmatpush1.msra.mxu0 %v81_v2  ;;  %179 = vmatpush1.msra.mxu1 %v83_v4  ;;  %v77_v7 = vld [vmem:[%s973_s1 + $0x1c0] sm:$0xff]  ;;  %v79_v8 = vld [vmem:[%s973_s1 + $0x1d0] sm:$0xff]  ;;  %v74_v9 = vld [vmem:[%s973_s1 + $0x1a8] sm:$0xff] }
   0x4   :  { %109 = vmatprep.subr.mxu0 %v78_v5  ;;  %180 = vmatprep.subr.mxu1 %v80_v6  ;;  %v76_v10 = vld [vmem:[%s973_s1 + $0x1b8] sm:$0xff]  ;;  %v73_v11 = vld [vmem:[%s973_s1 + $0x1a0] sm:$0xff]  ;;  %v75_v12 = vld [vmem:[%s973_s1 + $0x1b0] sm:$0xff] }
   0x5   :  { %110 = vmatpush1.msra.mxu0 %v77_v7  ;;  %181 = vmatpush1.msra.mxu1 %v79_v8  ;;  %v70_v13 = vld [vmem:[%s973_s1 + $0x188] sm:$0xff]  ;;  %v72_v14 = vld [vmem:[%s973_s1 + $0x198] sm:$0xff]  ;;  %v69_v15 = vld [vmem:[%s973_s1 + $0x180] sm:$0xff] }
   0x6   :  { %111 = vmatprep.subr.mxu0 %v74_v9  ;;  %182 = vmatprep.subr.mxu1 %v76_v10  ;;  %v71_v16 = vld [vmem:[%s973_s1 + $0x190] sm:$0xff]  ;;  %v66_v17 = vld [vmem:[%s973_s1 + $0x168] sm:$0xff]  ;;  %v68_v18 = vld [vmem:[%s973_s1 + $0x178] sm:$0xff] }
   0x7   :  { %112 = vmatpush1.msra.mxu0 %v73_v11  ;;  %183 = vmatpush1.msra.mxu1 %v75_v12  ;;  %v65_v19 = vld [vmem:[%s973_s1 + $0x160] sm:$0xff]  ;;  %v67_v20 = vld [vmem:[%s973_s1 + $0x170] sm:$0xff]  ;;  %v62_v21 = vld [vmem:[%s973_s1 + $0x148] sm:$0xff] }
   0x8   :  { %113 = vmatprep.subr.mxu0 %v70_v13  ;;  %184 = vmatprep.subr.mxu1 %v72_v14  ;;  %v64_v22 = vld [vmem:[%s973_s1 + $0x158] sm:$0xff]  ;;  %v61_v23 = vld [vmem:[%s973_s1 + $0x140] sm:$0xff]  ;;  %v63_v24 = vld [vmem:[%s973_s1 + $0x150] sm:$0xff] }
   0x9   :  { %114 = vmatpush1.msra.mxu0 %v69_v15  ;;  %185 = vmatpush1.msra.mxu1 %v71_v16  ;;  %v58_v25 = vld [vmem:[%s973_s1 + $0x128] sm:$0xff]  ;;  %v60_v26 = vld [vmem:[%s973_s1 + $0x138] sm:$0xff]  ;;  %v57_v27 = vld [vmem:[%s973_s1 + $0x120] sm:$0xff] }
   0xa   :  { %115 = vmatprep.subr.mxu0 %v66_v17  ;;  %186 = vmatprep.subr.mxu1 %v68_v18  ;;  %v59_v28 = vld [vmem:[%s973_s1 + $0x130] sm:$0xff]  ;;  %v54_v29 = vld [vmem:[%s973_s1 + $0x108] sm:$0xff]  ;;  %v56_v30 = vld [vmem:[%s973_s1 + $0x118] sm:$0xff] }
   0xb   :  { %116 = vmatpush1.msra.mxu0 %v65_v19  ;;  %187 = vmatpush1.msra.mxu1 %v67_v20  ;;  %v53_v31 = vld [vmem:[%s973_s1 + $0x100] sm:$0xff]  ;;  %v55_v32 = vld [vmem:[%s973_s1 + $0x110] sm:$0xff]  ;;  %v50_v33 = vld [vmem:[%s973_s1 + $0xe8] sm:$0xff] }
   0xc   :  { %117 = vmatprep.subr.mxu0 %v62_v21  ;;  %188 = vmatprep.subr.mxu1 %v64_v22  ;;  %v52_v34 = vld [vmem:[%s973_s1 + $0xf8] sm:$0xff]  ;;  %v49_v35 = vld [vmem:[%s973_s1 + $0xe0] sm:$0xff]  ;;  %v51_v36 = vld [vmem:[%s973_s1 + $0xf0] sm:$0xff] }
   0xd   :  { %118 = vmatpush1.msra.mxu0 %v61_v23  ;;  %189 = vmatpush1.msra.mxu1 %v63_v24  ;;  %v46_v37 = vld [vmem:[%s973_s1 + $0xc8] sm:$0xff]  ;;  %v48_v38 = vld [vmem:[%s973_s1 + $0xd8] sm:$0xff]  ;;  %v45_v39 = vld [vmem:[%s973_s1 + $0xc0] sm:$0xff] }
   0xe   :  { %119 = vmatprep.subr.mxu0 %v58_v25  ;;  %190 = vmatprep.subr.mxu1 %v60_v26  ;;  %v47_v40 = vld [vmem:[%s973_s1 + $0xd0] sm:$0xff]  ;;  %v42_v41 = vld [vmem:[%s973_s1 + $0xa8] sm:$0xff]  ;;  %v44_v42 = vld [vmem:[%s973_s1 + $0xb8] sm:$0xff] }
   0xf   :  { %120 = vmatpush1.msra.mxu0 %v57_v27  ;;  %191 = vmatpush1.msra.mxu1 %v59_v28  ;;  %v41_v43 = vld [vmem:[%s973_s1 + $0xa0] sm:$0xff]  ;;  %v43_v44 = vld [vmem:[%s973_s1 + $0xb0] sm:$0xff]  ;;  %v38_v45 = vld [vmem:[%s973_s1 + $0x88] sm:$0xff] }
  0x10   :  { %121 = vmatprep.subr.mxu0 %v54_v29  ;;  %192 = vmatprep.subr.mxu1 %v56_v30  ;;  %v40_v46 = vld [vmem:[%s973_s1 + $0x98] sm:$0xff]  ;;  %v37_v47 = vld [vmem:[%s973_s1 + $0x80] sm:$0xff]  ;;  %v39_v48 = vld [vmem:[%s973_s1 + $0x90] sm:$0xff] }
  0x11   :  { %122 = vmatpush1.msra.mxu0 %v53_v31  ;;  %193 = vmatpush1.msra.mxu1 %v55_v32  ;;  %v34_v49 = vld [vmem:[%s973_s1 + $0x68] sm:$0xff]  ;;  %v36_v50 = vld [vmem:[%s973_s1 + $0x78] sm:$0xff]  ;;  %v33_v51 = vld [vmem:[%s973_s1 + $0x60] sm:$0xff] }
  0x12   :  { %123 = vmatprep.subr.mxu0 %v50_v33  ;;  %194 = vmatprep.subr.mxu1 %v52_v34  ;;  %v35_v52 = vld [vmem:[%s973_s1 + $0x70] sm:$0xff]  ;;  %v30_v53 = vld [vmem:[%s973_s1 + $0x48] sm:$0xff]  ;;  %v32_v54 = vld [vmem:[%s973_s1 + $0x58] sm:$0xff] }
  0x13   :  { %124 = vmatpush1.msra.mxu0 %v49_v35  ;;  %195 = vmatpush1.msra.mxu1 %v51_v36  ;;  %v29_v55 = vld [vmem:[%s973_s1 + $0x40] sm:$0xff]  ;;  %v31_v56 = vld [vmem:[%s973_s1 + $0x50] sm:$0xff]  ;;  %v26_v57 = vld [vmem:[%s973_s1 + $0x28] sm:$0xff] }
  0x14   :  { %125 = vmatprep.subr.mxu0 %v46_v37  ;;  %196 = vmatprep.subr.mxu1 %v48_v38  ;;  %v28_v58 = vld [vmem:[%s973_s1 + $0x38] sm:$0xff]  ;;  %v25_v59 = vld [vmem:[%s973_s1 + $0x20] sm:$0xff]  ;;  %v27_v60 = vld [vmem:[%s973_s1 + $0x30] sm:$0xff] }
  0x15   :  { %126 = vmatpush1.msra.mxu0 %v45_v39  ;;  %197 = vmatpush1.msra.mxu1 %v47_v40  ;;  %v22_v61 = vld [vmem:[%s973_s1 + $0x8] sm:$0xff]  ;;  %v24_v62 = vld [vmem:[%s973_s1 + $0x18] sm:$0xff]  ;;  %v21_v63 = vld [vmem:[%s973_s1] sm:$0xff] }
  0x16   :  { %127 = vmatprep.subr.mxu0 %v42_v41  ;;  %198 = vmatprep.subr.mxu1 %v44_v42  ;;  %v23_v0 = vld [vmem:[%s973_s1 + $0x10] sm:$0xff]  ;;  %v20_v1 = vld [vmem:[%s974_s0] sm:$0x1]  ;;  %v284_v2 = vld [vmem:[%s975_s3 + $0xf8] sm:$0xff] }
  0x17   :  { %128 = vmatpush1.msra.mxu0 %v41_v43  ;;  %199 = vmatpush1.msra.mxu1 %v43_v44  ;;  %v316_v3 = vld [vmem:[%s975_s3 + $0x1f8] sm:$0xff]  ;;  %v283_v6 = vld [vmem:[%s975_s3 + $0xf0] sm:$0xff]  ;;  %v282_v10 = vld [vmem:[%s975_s3 + $0xe8] sm:$0xff] }
  0x18   :  { %129 = vmatprep.subr.mxu0 %v38_v45  ;;  %200 = vmatprep.subr.mxu1 %v40_v46  ;;  %v268_v4 = vld [vmem:[%s975_s3 + $0x78] sm:$0xff]  ;;  %v315_v7 = vld [vmem:[%s975_s3 + $0x1f0] sm:$0xff]  ;;  %v314_v11 = vld [vmem:[%s975_s3 + $0x1e8] sm:$0xff] }
  0x19   :  { %130 = vmatpush1.msra.mxu0 %v37_v47  ;;  %201 = vmatpush1.msra.mxu1 %v39_v48  ;;  %v300_v5 = vld [vmem:[%s975_s3 + $0x178] sm:$0xff]  ;;  %v267_v8 = vld [vmem:[%s975_s3 + $0x70] sm:$0xff]  ;;  %v266_v12 = vld [vmem:[%s975_s3 + $0x68] sm:$0xff] }
  0x1a   :  { %131 = vmatprep.subr.mxu0 %v34_v49  ;;  %202 = vmatprep.subr.mxu1 %v36_v50  ;;  %v299_v9 = vld [vmem:[%s975_s3 + $0x170] sm:$0xff]  ;;  %v298_v13 = vld [vmem:[%s975_s3 + $0x168] sm:$0xff]  ;;  %v281_v14 = vld [vmem:[%s975_s3 + $0xe0] sm:$0xff] }
  0x1b   :  { %132 = vmatpush1.msra.mxu0 %v33_v51  ;;  %203 = vmatpush1.msra.mxu1 %v35_v52  ;;  %v313_v15 = vld [vmem:[%s975_s3 + $0x1e0] sm:$0xff]  ;;  %v280_v18 = vld [vmem:[%s975_s3 + $0xd8] sm:$0xff]  ;;  %v279_v22 = vld [vmem:[%s975_s3 + $0xd0] sm:$0xff] }
  0x1c   :  { %133 = vmatprep.subr.mxu0 %v30_v53  ;;  %204 = vmatprep.subr.mxu1 %v32_v54  ;;  %v265_v16 = vld [vmem:[%s975_s3 + $0x60] sm:$0xff]  ;;  %v312_v19 = vld [vmem:[%s975_s3 + $0x1d8] sm:$0xff]  ;;  %v311_v23 = vld [vmem:[%s975_s3 + $0x1d0] sm:$0xff] }
  0x1d   :  { %134 = vmatpush1.msra.mxu0 %v29_v55  ;;  %205 = vmatpush1.msra.mxu1 %v31_v56  ;;  %v297_v17 = vld [vmem:[%s975_s3 + $0x160] sm:$0xff]  ;;  %v264_v20 = vld [vmem:[%s975_s3 + $0x58] sm:$0xff]  ;;  %v263_v24 = vld [vmem:[%s975_s3 + $0x50] sm:$0xff] }
  0x1e   :  { %135 = vmatprep.subr.mxu0 %v26_v57  ;;  %206 = vmatprep.subr.mxu1 %v28_v58  ;;  %v296_v21 = vld [vmem:[%s975_s3 + $0x158] sm:$0xff]  ;;  %v295_v25 = vld [vmem:[%s975_s3 + $0x150] sm:$0xff]  ;;  %v278_v26 = vld [vmem:[%s975_s3 + $0xc8] sm:$0xff] }
  0x1f   :  { %136 = vmatpush1.msra.mxu0 %v25_v59  ;;  %207 = vmatpush1.msra.mxu1 %v27_v60  ;;  %v310_v27 = vld [vmem:[%s975_s3 + $0x1c8] sm:$0xff]  ;;  %v277_v30 = vld [vmem:[%s975_s3 + $0xc0] sm:$0xff]  ;;  %v276_v34 = vld [vmem:[%s975_s3 + $0xb8] sm:$0xff] }
  0x20   :  { %137 = vmatprep.subr.mxu0 %v22_v61  ;;  %208 = vmatprep.subr.mxu1 %v24_v62  ;;  %v262_v28 = vld [vmem:[%s975_s3 + $0x48] sm:$0xff]  ;;  %v309_v31 = vld [vmem:[%s975_s3 + $0x1c0] sm:$0xff]  ;;  %v308_v35 = vld [vmem:[%s975_s3 + $0x1b8] sm:$0xff] }
  0x21   :  { %138 = vmatpush1.msra.mxu0 %v21_v63  ;;  %209 = vmatpush1.msra.mxu1 %v23_v0  ;;  %v294_v29 = vld [vmem:[%s975_s3 + $0x148] sm:$0xff]  ;;  %v261_v32 = vld [vmem:[%s975_s3 + $0x40] sm:$0xff]  ;;  %v260_v36 = vld [vmem:[%s975_s3 + $0x38] sm:$0xff] }
  0x22   :  { %172 = vmatmul.mubr.f32.vlgmr.msra.gmra.mxu0 %v20_v1  ;;  %243 = vmatmul.mubr.f32.vlgmr.msra.gmra.mxu1 %v20_v1  ;;  %v293_v33 = vld [vmem:[%s975_s3 + $0x140] sm:$0xff]  ;;  %v292_v37 = vld [vmem:[%s975_s3 + $0x138] sm:$0xff]  ;;  %v275_v38 = vld [vmem:[%s975_s3 + $0xb0] sm:$0xff] }
  0x23   :  { %471 = vmatprep.subr.mxu0 %v284_v2  ;;  %506 = vmatprep.subr.mxu1 %v316_v3  ;;  %v307_v39 = vld [vmem:[%s975_s3 + $0x1b0] sm:$0xff]  ;;  %v274_v42 = vld [vmem:[%s975_s3 + $0xa8] sm:$0xff]  ;;  %v273_v46 = vld [vmem:[%s975_s3 + $0xa0] sm:$0xff]  ;;  %v87_v2 = vlaneseq }
  0x24   :  { %472 = vmatpush3.msra.mxu0 %v268_v4  ;;  %507 = vmatpush3.msra.mxu1 %v300_v5  ;;  %v259_v40 = vld [vmem:[%s975_s3 + $0x30] sm:$0xff]  ;;  %v306_v43 = vld [vmem:[%s975_s3 + $0x1a8] sm:$0xff]  ;;  %v305_v47 = vld [vmem:[%s975_s3 + $0x1a0] sm:$0xff] }
  0x25   :  { %473 = vmatprep.subr.mxu0 %v283_v6  ;;  %508 = vmatprep.subr.mxu1 %v315_v7  ;;  %v291_v41 = vld [vmem:[%s975_s3 + $0x130] sm:$0xff]  ;;  %v258_v44 = vld [vmem:[%s975_s3 + $0x28] sm:$0xff]  ;;  %v257_v48 = vld [vmem:[%s975_s3 + $0x20] sm:$0xff]  ;;  %v88_v3 = vshrl.u32 %v87_v2, 7 }
  0x26   :  { %474 = vmatpush3.msra.mxu0 %v267_v8  ;;  %509 = vmatpush3.msra.mxu1 %v299_v9  ;;  %v290_v45 = vld [vmem:[%s975_s3 + $0x128] sm:$0xff]  ;;  %v289_v49 = vld [vmem:[%s975_s3 + $0x120] sm:$0xff]  ;;  %v272_v50 = vld [vmem:[%s975_s3 + $0x98] sm:$0xff] }
  0x27   :  { %475 = vmatprep.subr.mxu0 %v282_v10  ;;  %510 = vmatprep.subr.mxu1 %v314_v11  ;;  %v304_v51 = vld [vmem:[%s975_s3 + $0x198] sm:$0xff]  ;;  %v271_v54 = vld [vmem:[%s975_s3 + $0x90] sm:$0xff]  ;;  %v270_v58 = vld [vmem:[%s975_s3 + $0x88] sm:$0xff]  ;;  %v97_v4 = vsub.s32 2, %v88_v3  ;;  %v89_v5 = vsub.s32 0, %v88_v3  ;;  %v93_v7 = vsub.s32 1, %v88_v3 }
  0x28   :  { %476 = vmatpush3.msra.mxu0 %v266_v12  ;;  %511 = vmatpush3.msra.mxu1 %v298_v13  ;;  %v256_v52 = vld [vmem:[%s975_s3 + $0x18] sm:$0xff]  ;;  %v303_v55 = vld [vmem:[%s975_s3 + $0x190] sm:$0xff]  ;;  %v302_v59 = vld [vmem:[%s975_s3 + $0x188] sm:$0xff]  ;;  %v101_v8 = vsub.s32 3, %v88_v3 }
  0x29   :  { %477 = vmatprep.subr.mxu0 %v281_v14  ;;  %512 = vmatprep.subr.mxu1 %v313_v15  ;;  %v288_v53 = vld [vmem:[%s975_s3 + $0x118] sm:$0xff]  ;;  %v255_v56 = vld [vmem:[%s975_s3 + $0x10] sm:$0xff]  ;;  %v254_v60 = vld [vmem:[%s975_s3 + $0x8] sm:$0xff] }
  0x2a   :  { %478 = vmatpush3.msra.mxu0 %v265_v16  ;;  %513 = vmatpush3.msra.mxu1 %v297_v17  ;;  %v287_v57 = vld [vmem:[%s975_s3 + $0x110] sm:$0xff]  ;;  %v286_v61 = vld [vmem:[%s975_s3 + $0x108] sm:$0xff]  ;;  %v269_v62 = vld [vmem:[%s975_s3 + $0x80] sm:$0xff] }
  0x2b   :  { %479 = vmatprep.subr.mxu0 %v280_v18  ;;  %514 = vmatprep.subr.mxu1 %v312_v19  ;;  %v301_v63 = vld [vmem:[%s975_s3 + $0x180] sm:$0xff] }
  0x2c   :  { %480 = vmatpush3.msra.mxu0 %v264_v20  ;;  %515 = vmatpush3.msra.mxu1 %v296_v21  ;;  %v253_v0 = vld [vmem:[%s975_s3] sm:$0xff] }
  0x2d   :  { %481 = vmatprep.subr.mxu0 %v279_v22  ;;  %516 = vmatprep.subr.mxu1 %v311_v23  ;;  %v285_v1 = vld [vmem:[%s975_s3 + $0x100] sm:$0xff] }
  0x2e   :  { %482 = vmatpush3.msra.mxu0 %v263_v24  ;;  %517 = vmatpush3.msra.mxu1 %v295_v25  ;;  %v85_v6 = vld [vmem:[%s976_s2] sm:$0xf] }
  0x2f   :  { %483 = vmatprep.subr.mxu0 %v278_v26  ;;  %518 = vmatprep.subr.mxu1 %v310_v27  ;;  %v98_v9 = vrot.slane %v85_v6, %v97_v4  ;;  %v90_v10 = vrot.slane %v85_v6, %v89_v5  ;;  %v94_v11 = vrot.slane %v85_v6, %v93_v7  ;;  %v317_v27 = vld [vmem:[%s977_s4] sm:$0x1] }
  0x30   :  { %484 = vmatpush3.msra.mxu0 %v262_v28  ;;  %519 = vmatpush3.msra.mxu1 %v294_v29  ;;  %v102_v12 = vrot.slane %v85_v6, %v101_v8 }
  0x31   :  { %485 = vmatprep.subr.mxu0 %v277_v30  ;;  %520 = vmatprep.subr.mxu1 %v309_v31 }
  0x32   :  { %486 = vmatpush3.msra.mxu0 %v261_v32  ;;  %521 = vmatpush3.msra.mxu1 %v293_v33 }
  0x33   :  { %487 = vmatprep.subr.mxu0 %v276_v34  ;;  %522 = vmatprep.subr.mxu1 %v308_v35 }
  0x34   :  { %488 = vmatpush3.msra.mxu0 %v260_v36  ;;  %523 = vmatpush3.msra.mxu1 %v292_v37 }
  0x35   :  { %489 = vmatprep.subr.mxu0 %v275_v38  ;;  %524 = vmatprep.subr.mxu1 %v307_v39 }
  0x36   :  { %490 = vmatpush3.msra.mxu0 %v259_v40  ;;  %525 = vmatpush3.msra.mxu1 %v291_v41 }
  0x37   :  { %491 = vmatprep.subr.mxu0 %v274_v42  ;;  %526 = vmatprep.subr.mxu1 %v306_v43 }
  0x38   :  { %492 = vmatpush3.msra.mxu0 %v258_v44  ;;  %527 = vmatpush3.msra.mxu1 %v290_v45 }
  0x39   :  { %493 = vmatprep.subr.mxu0 %v273_v46  ;;  %528 = vmatprep.subr.mxu1 %v305_v47 }
  0x3a   :  { %494 = vmatpush3.msra.mxu0 %v257_v48  ;;  %529 = vmatpush3.msra.mxu1 %v289_v49 }
  0x3b   :  { %495 = vmatprep.subr.mxu0 %v272_v50  ;;  %530 = vmatprep.subr.mxu1 %v304_v51 }
  0x3c   :  { %496 = vmatpush3.msra.mxu0 %v256_v52  ;;  %531 = vmatpush3.msra.mxu1 %v288_v53 }
  0x3d   :  { %497 = vmatprep.subr.mxu0 %v271_v54  ;;  %532 = vmatprep.subr.mxu1 %v303_v55 }
  0x3e   :  { %498 = vmatpush3.msra.mxu0 %v255_v56  ;;  %533 = vmatpush3.msra.mxu1 %v287_v57 }
  0x3f   :  { %499 = vmatprep.subr.mxu0 %v270_v58  ;;  %534 = vmatprep.subr.mxu1 %v302_v59 }
  0x40   :  { %500 = vmatpush3.msra.mxu0 %v254_v60  ;;  %535 = vmatpush3.msra.mxu1 %v286_v61 }
  0x41   :  { %501 = vmatprep.subr.mxu0 %v269_v62  ;;  %536 = vmatprep.subr.mxu1 %v301_v63 }
  0x42   :  { %502 = vmatpush3.msra.mxu0 %v253_v0  ;;  %537 = vmatpush3.msra.mxu1 %v285_v1 }
  0xe2   :  { %v173_v13 = vpop.f32.mrf.mxu0  ;;  %v244_v14 = vpop.f32.mrf.mxu1 }
  0xe3   :  { %v245_v15 = vadd.f32 %v244_v14, %v98_v9  ;;  %v174_v16 = vadd.f32 %v173_v13, %v90_v10 }
  0xe4   :  { %v175_v17 = vpop.f32.mrf.mxu0  ;;  %v246_v18 = vpop.f32.mrf.mxu1 }
  0xe5   :  { %v176_v19 = vadd.f32 %v175_v17, %v94_v11  ;;  %v247_v20 = vadd.f32 %v246_v18, %v102_v12  ;;  %v251_v21 = vmax.f32 %v245_v15, 0.0  ;;  %v249_v24 = vmax.f32 %v174_v16, 0.0 }
  0xe7   :  { %v250_v22 = vmax.f32 %v176_v19, 0.0  ;;  %v252_v23 = vmax.f32 %v247_v20, 0.0 }
  0xe9   :  { %382 = vmatprep.mubr.f32.mxu0 %v250_v22  ;;  %452 = vmatprep.mubr.f32.mxu1 %v252_v23 }
  0xea   :  { %383 = vmatmul.mubr.f32.vlgmr.msra.gmra.mxu0 %v249_v24  ;;  %453 = vmatmul.mubr.f32.vlgmr.msra.gmra.mxu1 %v251_v21 }
 0x1aa   :  { %v503_v25 = vpop.f32.mrf.mxu0  ;;  %v538_v26 = vpop.f32.mrf.mxu1 }
 0x1ac   :  { %v504_v28 = vpop.f32.mrf.mxu0  ;;  %v539_v29 = vpop.f32.mrf.mxu1 }
 0x1ad   :  { %v505_v30 = vadd.f32 %v504_v28, %v503_v25  ;;  %v540_v32 = vadd.f32 %v539_v29, %v538_v26 }
 0x1af   :  { %v385_v31 = vadd.f32 %v505_v30, %v317_v27 }
 0x1b1   :  { %v455_v33 = vadd.f32 %v540_v32, %v385_v31 }
 0x1b3   :  { %v470_v34 = vmul.f32 -1.442695, %v455_v33 }
 0x1b5   :  { %542 = vpow2.f32 %v470_v34 }
 0x1c2   :  { %v543_v35 = vpop.eup %542 }
 0x1c3   :  { %v461_v36 = vadd.f32 1.0, %v543_v35 }
 0x1c5   :  { %544 = vrcp.f32 %v461_v36 }
 0x1d2   :  { %v545_v37 = vpop.eup %544 }
 0x1d3   :  { %465 = vst.msk [vmem:[%s978_s5] sm:$0x1] %vm464_vm0, %v545_v37 }

</bundles_post_ra>
